<compile_context>
chip_gen: v6e
topology: v6e:2x2x1
jax: 0.10.0
libtpu: 0.0.40
codegen_flags: <defaults>
</compile_context>

<pallas_src>
import jax
import jax.numpy as jnp
from jax.experimental import pallas as pl
from jax.experimental.pallas import tpu as pltpu


# ----------------------------- Pallas kernel --------------------------------

def _rendering_mlp_kernel(geom_ref, feat_ref,
                          w0g_ref, w0f_ref, b0_ref,
                          w1_ref, b1_ref,
                          w2_ref, b2_ref,
                          o_ref):
    """One row-tile of the rendering MLP (mode='idr', squeeze_out=True).

    layer0: relu(concat(pts, vd, nrm, feat) @ W0 + b0)  -- two partial dots
    layer1: relu(h @ W1 + b1)
    layer2: sigmoid(h @ W2 + b2), produced transposed as (d_out, tm) so the
            bias add, sigmoid and stores all stay lane-dense.
    Everything is f32 (MXU accumulates in f32) -> exact module semantics.
    """
    f32 = jnp.float32

    # Layer 0: fused "concat + matmul" as two partial dots
    # (concat order: [points, view_dirs, normals] | feature_vectors).
    h = (jnp.dot(geom_ref[...], w0g_ref[...], preferred_element_type=f32)
         + jnp.dot(feat_ref[...], w0f_ref[...], preferred_element_type=f32)
         + b0_ref[...])
    h = jnp.maximum(h, 0.0)                                # ReLU (layer 0)

    # Layer 1
    h = jnp.dot(h, w1_ref[...], preferred_element_type=f32) + b1_ref[...]
    h = jnp.maximum(h, 0.0)                                # ReLU (layer 1)

    # Layer 2, produced transposed: (d_out, tm) = W2^T @ H^T
    y = jax.lax.dot_general(w2_ref[...], h, (((0,), (1,)), ((), ())),
                            preferred_element_type=f32)
    y = y + b2_ref[...]                                    # b2 is (d_out, 1)
    o_ref[...] = jax.nn.sigmoid(y).astype(o_ref.dtype)     # squeeze_out=True


# ------------------------------- wrapper -------------------------------------

def _round_up(x, m):
    return (x + m - 1) // m * m


def _choose_row_tile(n, tm_max):
    """Row tile: multiple of 128, as large as tm_max, but small enough that
    there are at least two grid steps when there is enough work (so the
    'parallel' grid axis can be shared by both TensorCores of a megacore)."""
    tm_max = max(128, _round_up(tm_max, 128))
    if n <= 128:
        return 128
    half = _round_up((n + 1) // 2, 128)
    return min(tm_max, half)


def rendering_network_forward(points, normals, view_dirs, feature_vectors,
                              params, *, tm=8192, channels_last=True):
    """Pallas implementation of RenderingNetwork.forward (mode='idr').

    params: [(w0, b0), (w1, b1), (w2, b2)] effective (weight-normed) weights,
            stored as (in, out) so the math is x @ W + b.
    channels_last=True returns (N, d_out) like the PyTorch module; pass False
    to consume the kernel-native lane-dense (d_out, N) layout directly and
    skip the final transpose pass.
    """
    n = points.shape[0]
    d_feature = feature_vectors.shape[-1]
    d_geom = points.shape[-1] + view_dirs.shape[-1] + normals.shape[-1]  # 9
    (w0, b0), (w1, b1), (w2, b2) = params
    d_out = w2.shape[1]

    tm = _choose_row_tile(n, tm)
    grid = pl.cdiv(n, tm)

    f32 = jnp.float32
    # Cheap concat of only the three 3-wide streams (36 B/row of real data);
    # the wide feature stream is passed through with no wrapper copy.
    geom = jnp.concatenate([points.astype(f32), view_dirs.astype(f32),
                            normals.astype(f32)], axis=-1)            # (n, 9)
    feat = feature_vectors.astype(f32)                                 # (n, d_feature)

    # Split W0 by input block so layer 0 needs no fully-concatenated input.
    w0 = w0.astype(f32)
    w0g, w0f = w0[:d_geom], w0[d_geom:]
    w1 = w1.astype(f32)
    w2 = w2.astype(f32)
    b0_2d = b0.reshape(1, -1).astype(f32)
    b1_2d = b1.reshape(1, -1).astype(f32)
    b2_2d = b2.reshape(-1, 1).astype(f32)     # (d_out, 1) for the transposed out

    rows = lambda c: pl.BlockSpec((tm, c), lambda i: (i, 0))
    full = lambda a: pl.BlockSpec(a.shape, lambda i: (0, 0))

    out_t = pl.pallas_call(
        _rendering_mlp_kernel,
        out_shape=jax.ShapeDtypeStruct((d_out, n), f32),
        grid_spec=pltpu.PrefetchScalarGridSpec(
            num_scalar_prefetch=0,
            grid=(grid,),
            in_specs=[
                rows(d_geom), rows(d_feature),                 # tiled inputs
                full(w0g), full(w0f), full(b0_2d),
                full(w1), full(b1_2d),
                full(w2), full(b2_2d),
            ],
            out_specs=pl.BlockSpec((d_out, tm), lambda i: (0, i)),
        ),
        compiler_params=pltpu.CompilerParams(
            dimension_semantics=("parallel",),
            vmem_limit_bytes=48 * 1024 * 1024),
    )(geom, feat, w0g, w0f, b0_2d, w1, b1_2d, w2, b2_2d)

    if channels_last:
        return out_t.T            # module contract: (N, d_out)
    return out_t                  # lane-dense (d_out, N), no extra pass


# ------------------------- parameter construction ---------------------------

def init_weight_normed_linear(key, d_in, d_out):
    """Deterministic init of a weight-normed Linear; returns effective (W, b).

    PyTorch stores weight as (out, in); we keep the math-equivalent (in, out)
    so the kernel does x @ W + b. weight_norm(dim=0) normalizes each output
    row of the PyTorch weight, i.e. each *column* of our (in, out) matrix.
    """
    kv, kg, kb = jax.random.split(key, 3)
    bound = 1.0 / jnp.sqrt(jnp.float32(d_in))
    v = jax.random.uniform(kv, (d_in, d_out), jnp.float32, -bound, bound)
    g = jax.random.uniform(kg, (d_out,), jnp.float32, 0.5, 1.5)
    b = jax.random.uniform(kb, (d_out,), jnp.float32, -bound, bound)
    col_norm = jnp.sqrt(jnp.sum(v * v, axis=0, keepdims=True))  # (1, d_out)
    w_eff = v / col_norm * g[None, :]
    return w_eff, b


def build_params(key, dims):
    params = []
    for l in range(len(dims) - 1):
        key, sub = jax.random.split(key)
        params.append(init_weight_normed_linear(sub, dims[l], dims[l + 1]))
    return params


# ------------------------------ reference ------------------------------------

def reference_forward(points, normals, view_dirs, feature_vectors, params):
    """Plain-JAX f32 reference (mode='idr', squeeze_out=True)."""
    x = jnp.concatenate([points, view_dirs, normals, feature_vectors], axis=-1)
    (w0, b0), (w1, b1), (w2, b2) = params
    hp = jax.lax.Precision.HIGHEST
    h = jnp.maximum(jnp.dot(x, w0, precision=hp) + b0, 0.0)
    h = jnp.maximum(jnp.dot(h, w1, precision=hp) + b1, 0.0)
    return jax.nn.sigmoid(jnp.dot(h, w2, precision=hp) + b2)


# --------------------------------- main ---------------------------------------

if __name__ == "__main__":
    # Module config
    d_feature, d_in, d_out, d_hidden, n_layers = 32, 9, 3, 32, 2
    dims = [d_in + d_feature] + [d_hidden] * n_layers + [d_out]  # [41, 32, 32, 3]

    key = jax.random.PRNGKey(0)
    kpts, knrm, kvd, kfeat, kparam = jax.random.split(key, 5)

    N = 256
    points = jax.random.normal(kpts, (N, 3), jnp.float32)
    normals = jax.random.normal(knrm, (N, 3), jnp.float32)
    view_dirs = jax.random.normal(kvd, (N, 3), jnp.float32)
    feature_vectors = jax.random.normal(kfeat, (N, d_feature), jnp.float32)

    params = build_params(kparam, dims)

    out = rendering_network_forward(points, normals, view_dirs, feature_vectors,
                                    params)
    out = jax.block_until_ready(out)
    assert out.shape == (N, d_out), out.shape

    ref = reference_forward(points, normals, view_dirs, feature_vectors, params)
    err = float(jnp.max(jnp.abs(out - ref)))
    assert jnp.allclose(out, ref, atol=2e-3, rtol=2e-3), err

    # Ragged N (not a multiple of the row tile): exercises the no-pad cdiv grid
    # with clipped edge-block DMAs.
    M = 200
    out2 = rendering_network_forward(points[:M], normals[:M], view_dirs[:M],
                                     feature_vectors[:M], params)
    out2 = jax.block_until_ready(out2)
    assert out2.shape == (M, d_out), out2.shape
    ref2 = reference_forward(points[:M], normals[:M], view_dirs[:M],
                             feature_vectors[:M], params)
    assert jnp.allclose(out2, ref2, atol=2e-3, rtol=2e-3), \
        float(jnp.max(jnp.abs(out2 - ref2)))

    print("KERNEL_OK")
</pallas_src>

<mosaic_0001>
module attributes {stable_mosaic.version = 11 : i64} {
  func.func @_rendering_mlp_kernel(%arg0: i32, %arg1: memref<128x9xf32, #tpu.memory_space<vmem>>, %arg2: memref<128x32xf32, #tpu.memory_space<vmem>>, %arg3: memref<9x32xf32, #tpu.memory_space<vmem>>, %arg4: memref<32x32xf32, #tpu.memory_space<vmem>>, %arg5: memref<1x32xf32, #tpu.memory_space<vmem>>, %arg6: memref<32x32xf32, #tpu.memory_space<vmem>>, %arg7: memref<1x32xf32, #tpu.memory_space<vmem>>, %arg8: memref<32x3xf32, #tpu.memory_space<vmem>>, %arg9: memref<3x1xf32, #tpu.memory_space<vmem>>, %arg10: memref<3x128xf32, #tpu.memory_space<vmem>>) attributes {dimension_semantics = [#tpu.dimension_semantics<parallel>], iteration_bounds = array<i64: 2>, scalar_prefetch = 0 : i64, scratch_operands = 0 : i64, tpu.core_type = #tpu.core_type<tc>, window_params = [{transform_indices = @transform_0, window_bounds = array<i64: 128, 9>}, {transform_indices = @transform_1, window_bounds = array<i64: 128, 32>}, {pipeline_mode = #tpu.pipeline_mode<synchronous>, transform_indices = @transform_2, window_bounds = array<i64: 9, 32>}, {pipeline_mode = #tpu.pipeline_mode<synchronous>, transform_indices = @transform_3, window_bounds = array<i64: 32, 32>}, {pipeline_mode = #tpu.pipeline_mode<synchronous>, transform_indices = @transform_4, window_bounds = array<i64: 1, 32>}, {pipeline_mode = #tpu.pipeline_mode<synchronous>, transform_indices = @transform_5, window_bounds = array<i64: 32, 32>}, {pipeline_mode = #tpu.pipeline_mode<synchronous>, transform_indices = @transform_6, window_bounds = array<i64: 1, 32>}, {pipeline_mode = #tpu.pipeline_mode<synchronous>, transform_indices = @transform_7, window_bounds = array<i64: 32, 3>}, {pipeline_mode = #tpu.pipeline_mode<synchronous>, transform_indices = @transform_8, window_bounds = array<i64: 3, 1>}, {transform_indices = @transform_9, window_bounds = array<i64: 3, 128>}]} {
    %c0 = arith.constant 0 : index
    %c0_0 = arith.constant 0 : index
    %0 = vector.load %arg1[%c0, %c0_0] : memref<128x9xf32, #tpu.memory_space<vmem>>, vector<128x9xf32>
    %c0_1 = arith.constant 0 : index
    %c0_2 = arith.constant 0 : index
    %1 = vector.load %arg3[%c0_1, %c0_2] : memref<9x32xf32, #tpu.memory_space<vmem>>, vector<9x32xf32>
    %cst = arith.constant dense<0.000000e+00> : vector<128x32xf32>
    %2 = tpu.matmul %0, %1, %cst {dimension_numbers = #tpu.dot_dimension_numbers<[1], [0], [0], [1], [0, 0, 1, 1], [], []>} : vector<128x9xf32>, vector<9x32xf32>, vector<128x32xf32> -> vector<128x32xf32>
    %c0_3 = arith.constant 0 : index
    %c0_4 = arith.constant 0 : index
    %3 = vector.load %arg2[%c0_3, %c0_4] : memref<128x32xf32, #tpu.memory_space<vmem>>, vector<128x32xf32>
    %c0_5 = arith.constant 0 : index
    %c0_6 = arith.constant 0 : index
    %4 = vector.load %arg4[%c0_5, %c0_6] : memref<32x32xf32, #tpu.memory_space<vmem>>, vector<32x32xf32>
    %cst_7 = arith.constant dense<0.000000e+00> : vector<128x32xf32>
    %5 = tpu.matmul %3, %4, %cst_7 {dimension_numbers = #tpu.dot_dimension_numbers<[1], [0], [0], [1], [0, 0, 1, 1], [], []>} : vector<128x32xf32>, vector<32x32xf32>, vector<128x32xf32> -> vector<128x32xf32>
    %6 = arith.addf %2, %5 : vector<128x32xf32>
    %c0_8 = arith.constant 0 : index
    %c0_9 = arith.constant 0 : index
    %7 = vector.load %arg5[%c0_8, %c0_9] : memref<1x32xf32, #tpu.memory_space<vmem>>, vector<1x32xf32>
    %8 = vector.broadcast %7 : vector<1x32xf32> to vector<128x32xf32>
    %9 = arith.addf %6, %8 : vector<128x32xf32>
    %cst_10 = arith.constant 0.000000e+00 : f32
    %10 = vector.broadcast %cst_10 : f32 to vector<128x32xf32>
    %11 = arith.maximumf %9, %10 : vector<128x32xf32>
    %c0_11 = arith.constant 0 : index
    %c0_12 = arith.constant 0 : index
    %12 = vector.load %arg6[%c0_11, %c0_12] : memref<32x32xf32, #tpu.memory_space<vmem>>, vector<32x32xf32>
    %cst_13 = arith.constant dense<0.000000e+00> : vector<128x32xf32>
    %13 = tpu.matmul %11, %12, %cst_13 {dimension_numbers = #tpu.dot_dimension_numbers<[1], [0], [0], [1], [0, 0, 1, 1], [], []>} : vector<128x32xf32>, vector<32x32xf32>, vector<128x32xf32> -> vector<128x32xf32>
    %c0_14 = arith.constant 0 : index
    %c0_15 = arith.constant 0 : index
    %14 = vector.load %arg7[%c0_14, %c0_15] : memref<1x32xf32, #tpu.memory_space<vmem>>, vector<1x32xf32>
    %15 = vector.broadcast %14 : vector<1x32xf32> to vector<128x32xf32>
    %16 = arith.addf %13, %15 : vector<128x32xf32>
    %cst_16 = arith.constant 0.000000e+00 : f32
    %17 = vector.broadcast %cst_16 : f32 to vector<128x32xf32>
    %18 = arith.maximumf %16, %17 : vector<128x32xf32>
    %c0_17 = arith.constant 0 : index
    %c0_18 = arith.constant 0 : index
    %19 = vector.load %arg8[%c0_17, %c0_18] : memref<32x3xf32, #tpu.memory_space<vmem>>, vector<32x3xf32>
    %cst_19 = arith.constant dense<0.000000e+00> : vector<3x128xf32>
    %20 = tpu.matmul %19, %18, %cst_19 {dimension_numbers = #tpu.dot_dimension_numbers<[0], [1], [1], [0], [0, 1, 1, 0], [], []>} : vector<32x3xf32>, vector<128x32xf32>, vector<3x128xf32> -> vector<3x128xf32>
    %c0_20 = arith.constant 0 : index
    %c0_21 = arith.constant 0 : index
    %21 = vector.load %arg9[%c0_20, %c0_21] : memref<3x1xf32, #tpu.memory_space<vmem>>, vector<3x1xf32>
    %22 = vector.broadcast %21 : vector<3x1xf32> to vector<3x128xf32>
    %23 = arith.addf %20, %22 : vector<3x128xf32>
    %24 = arith.negf %23 : vector<3x128xf32>
    %25 = math.exp %24 : vector<3x128xf32>
    %cst_22 = arith.constant 1.000000e+00 : f32
    %26 = vector.broadcast %cst_22 : f32 to vector<3x128xf32>
    %27 = arith.addf %26, %25 : vector<3x128xf32>
    %28 = arith.divf %26, %27 : vector<3x128xf32>
    %c0_23 = arith.constant 0 : index
    %c0_24 = arith.constant 0 : index
    %29 = vector.load %arg10[%c0_23, %c0_24] : memref<3x128xf32, #tpu.memory_space<vmem>>, vector<3x128xf32>
    tpu.vector_store %arg10[%c0_23, %c0_24], %28 {strides = array<i32>} : memref<3x128xf32, #tpu.memory_space<vmem>>, vector<3x128xf32>,
    return
  }
  func.func @transform_0(%arg0: i32) -> (i32, i32) {
    %c0_i32 = arith.constant 0 : i32
    %c0_i32_0 = arith.constant 0 : i32
    return %arg0, %c0_i32 : i32, i32
  }
  func.func @transform_1(%arg0: i32) -> (i32, i32) {
    %c0_i32 = arith.constant 0 : i32
    %c0_i32_0 = arith.constant 0 : i32
    return %arg0, %c0_i32 : i32, i32
  }
  func.func @transform_2(%arg0: i32) -> (i32, i32) {
    %c0_i32 = arith.constant 0 : i32
    %c0_i32_0 = arith.constant 0 : i32
    %c0_i32_1 = arith.constant 0 : i32
    return %c0_i32, %c0_i32_0 : i32, i32
  }
  func.func @transform_3(%arg0: i32) -> (i32, i32) {
    %c0_i32 = arith.constant 0 : i32
    %c0_i32_0 = arith.constant 0 : i32
    %c0_i32_1 = arith.constant 0 : i32
    return %c0_i32, %c0_i32_0 : i32, i32
  }
  func.func @transform_4(%arg0: i32) -> (i32, i32) {
    %c0_i32 = arith.constant 0 : i32
    %c0_i32_0 = arith.constant 0 : i32
    %c0_i32_1 = arith.constant 0 : i32
    return %c0_i32, %c0_i32_0 : i32, i32
  }
  func.func @transform_5(%arg0: i32) -> (i32, i32) {
    %c0_i32 = arith.constant 0 : i32
    %c0_i32_0 = arith.constant 0 : i32
    %c0_i32_1 = arith.constant 0 : i32
    return %c0_i32, %c0_i32_0 : i32, i32
  }
  func.func @transform_6(%arg0: i32) -> (i32, i32) {
    %c0_i32 = arith.constant 0 : i32
    %c0_i32_0 = arith.constant 0 : i32
    %c0_i32_1 = arith.constant 0 : i32
    return %c0_i32, %c0_i32_0 : i32, i32
  }
  func.func @transform_7(%arg0: i32) -> (i32, i32) {
    %c0_i32 = arith.constant 0 : i32
    %c0_i32_0 = arith.constant 0 : i32
    %c0_i32_1 = arith.constant 0 : i32
    return %c0_i32, %c0_i32_0 : i32, i32
  }
  func.func @transform_8(%arg0: i32) -> (i32, i32) {
    %c0_i32 = arith.constant 0 : i32
    %c0_i32_0 = arith.constant 0 : i32
    %c0_i32_1 = arith.constant 0 : i32
    return %c0_i32, %c0_i32_0 : i32, i32
  }
  func.func @transform_9(%arg0: i32) -> (i32, i32) {
    %c0_i32 = arith.constant 0 : i32
    %c0_i32_0 = arith.constant 0 : i32
    return %c0_i32, %arg0 : i32, i32
  }
}

</mosaic_0001>

<bundles_post_ra>
// kernel: tpu_custom_call.1
= control target key start
LH: loop header
LB: loop body
LE: loop exit
PB: predicated region body
PF: predicated region fallthrough
CT: control target
= control target key end

     0   :  { %14 = vsyncpa [#allocation3], 0  ;;  %s2038_s0 = inlined_call_operand.vmem [shape: f32[256,9], index: 0, kind: input, shape index: {}]   ;;  %s2039_s1 = inlined_call_operand.vmem [shape: f32[256,32], index: 1, kind: input, shape index: {}]   ;;  %s2040_s2 = inlined_call_operand.vmem [shape: f32[9,32], index: 2, kind: input, shape index: {}]   ;;  %s2041_s3 = inlined_call_operand.vmem [shape: f32[32,32], index: 3, kind: input, shape index: {}]   ;;  %s2042_s4 = inlined_call_operand.vmem [shape: f32[1,32], index: 4, kind: input, shape index: {}]   ;;  %s2043_s5 = inlined_call_operand.vmem [shape: f32[32,32], index: 5, kind: input, shape index: {}]   ;;  %s2044_s6 = inlined_call_operand.vmem [shape: f32[1,32], index: 6, kind: input, shape index: {}]   ;;  %s2045_s7 = inlined_call_operand.vmem [shape: f32[32,3], index: 7, kind: input, shape index: {}]   ;;  %s2046_s8 = inlined_call_operand.vmem [shape: f32[3,1], index: 8, kind: input, shape index: {}]   ;;  %s2047_s9 = inlined_call_operand.hbm [shape: f32[3,256], index: 9, kind: output, shape index: {}]  }
   0x1   :  { %16 = vsyncpa [#allocation3 + $0x1], 0  ;;  %s1747_s30 = smov 0   ;;  %s1749_s10 = smov 0  }
   0x2   :  { %s1751_s11 = smov 0   ;;  %s1753_s12 = smov 0  }
   0x3 LB: > { %s1768_s13 = sadd.s32 4294967295, %s1691_s12   ;;  %s1299_s14 = sadd.s32 4294967294, %s1691_s12   ;;  %s1691_s12 = sphi %s1753_s12, %s2053_s12   ;;  %s1687_s11 = sphi %s1751_s11, %s2052_s11   ;;  %s1683_s10 = sphi %s1749_s10, %s2051_s10   ;;  %s1679_s30 = sphi %s1747_s30, %s2050_s30  }
   0x4   : > { %s1772_s15 = sadd.s32 1, %s1691_s12   ;;  %s228_s16 = sadd.s32 1, %s1687_s11 }
   0x5   : > { %s225_s17 = ssub.s32 %s1691_s12, %s1772_s15  ;;  %p238_p0 = scmp.ne.s32.totalorder %s1687_s11, %s1683_s10 }
   0x6   : > { %p226_p1 = scmp.eq.s32.totalorder %s225_s17, 0  ;;  %p239_p2 = scmp.eq.s32.totalorder %s1768_s13, 1 }
   0x7   : > { %p244_p3 = scmp.ne.s32.totalorder %s1683_s10, %s1679_s30  ;;  %p245_p4 = scmp.eq.s32.totalorder %s1299_s14, 1 }
   0x8   : > { %s1783_s18 = scalar_select %p226_p1, %s1687_s11, %s228_s16  }
   0x9   : > { %p1785_p5 = por %p239_p2, %p238_p0  ;;  %p1789_p6 = por %p245_p4, %p244_p3 }
   0xa   : > { %p1302_p7 = scmp.ge.s32.totalorder %s1691_s12, 1  ;;  %p302_p8 = scmp.lt.s32.totalorder %s1691_s12, 3 }
   0xc   : > { %p303_p9 = pnand %p1302_p7, %p302_p8 }
   0xd   : > { %s1304_s25 = sshll.u32 (!%p303_p9), %s1768_s13, 4  ;;  %s340_s29 = sand.u32 (!%p303_p9), 1, %s1683_s10  }
   0xe   : > { %306 = sbr.rel (%p303_p9) target bundleno = 758 (0x2f6), region = 56  ;;  %p344_p10 = scmp.lt.s32.totalorder (!%p303_p9), %s1304_s25, 31 }
   0xf   : > { %s1378_s14 = sshll.u32 (!%p303_p9), %s1768_s13, 6  ;;  %s1215_s23 = scalar_lea.sflag (!%p303_p9), [#allocation3], %s340_s29 }
  0x10   : > { %s2003_s22 = scalar_lea.hbm (!%p303_p9), %s2047_s9, %s1378_s14  ;;  %s1696_s26 = smov (!%p303_p9), [#allocation2]  }
  0x11   : > { %s1635_s27 = sshll.u32 (!%p303_p9), %s1696_s26, 4  ;;  %s1636_s27 = int_to_ptr.vmem [resolvable:$false] %s1635_s27 }
  0x12   : > { %s1637_s13 = scalar_lea.vmem (!%p303_p9), %s1636_s27, 128 }
  0x13   : > { %v392_v0 = vld [vmem:[%s2041_s3 + $0x18] sm:$0xff]  ;;  %v391_v1 = vld [vmem:[%s2041_s3 + $0x10] sm:$0xff]  ;;  %vm636_vm0 = vcmask 1040384   ;;  %v372_v2 = vld [vmem:[%s2040_s2 + $0x8] sm:$0x1]  ;;  %s2055_s25 = smov (!%p344_p10, %s1304_s25), 31 }
  0x14   : > { %1456 = vmatprep.subr.mxu0 %v392_v0  ;;  %v371_v3 = vld [vmem:[%s2040_s2] sm:$0xff]  ;;  %v390_v4 = vld [vmem:[%s2041_s3 + $0x8] sm:$0xff]  ;;  %1488 = vmatprep.subr.msk.mxu1 %vm636_vm0, %v372_v2  ;;  %v827_v5 = vld [vmem:[%s2043_s5 + $0x18] sm:$0xff]  ;;  %s1305_s24 = sshll.u32 %s2055_s25, 3  ;;  %vm393_vm1 = vcmask 261120   ;;  %vm587_vm2 = vcmask 72704  }
  0x15   : > { %1457 = vmatpush3.msra.mxu0 %v392_v0  ;;  %1489 = vmatpush3.msk.msra.mxu1 %vm636_vm0, %v372_v2  ;;  %v389_v6 = vld [vmem:[%s2041_s3] sm:$0xff]  ;;  %s1820_s28 = scalar_lea.vmem %s2039_s1, %s1305_s24  ;;  %s1825_s16 = scalar_lea.vmem %s2038_s0, %s1305_s24  ;;  %v826_v13 = vld [vmem:[%s2043_s5 + $0x10] sm:$0xff]  ;;  %v825_v18 = vld [vmem:[%s2043_s5 + $0x8] sm:$0xff]  ;;  %vm1694_vm3 = vmmov 0  }
  0x16   : > { %1458 = vmatprep.subr.mxu0 %v391_v1  ;;  %1490 = vmatprep.subr.mxu1 %v371_v3  ;;  %v373_v7 = vld [vmem:[%s1820_s28] sm:$0xff]  ;;  %v374_v9 = vld [vmem:[%s1820_s28 + $0x8] sm:$0xff]  ;;  %v375_v11 = vld [vmem:[%s1820_s28 + $0x10] sm:$0xff] }
  0x17   : > { %1459 = vmatpush3.msra.mxu0 %v391_v1  ;;  %1491 = vmatpush3.msra.mxu1 %v371_v3  ;;  %v355_v8 = vld [vmem:[%s1825_s16] sm:$0xff]  ;;  %v356_v10 = vld [vmem:[%s1825_s16 + $0x8] sm:$0xff]  ;;  %v357_v12 = vld [vmem:[%s1825_s16 + $0x10] sm:$0xff] }
  0x18   : > { %1460 = vmatprep.subr.mxu0 %v390_v4  ;;  %1516 = vmatprep.subr.mxu1 %v827_v5  ;;  %v376_v14 = vld [vmem:[%s1820_s28 + $0x18] sm:$0xff]  ;;  %v377_v16 = vld [vmem:[%s1820_s28 + $0x20] sm:$0xff]  ;;  %v378_v19 = vld [vmem:[%s1820_s28 + $0x28] sm:$0xff] }
  0x19   : > { %1461 = vmatpush3.msra.mxu0 %v390_v4  ;;  %1464 = vmatprep.mubr.msk.f32.mxu0 %vm393_vm1, %v373_v7  ;;  %v358_v15 = vld [vmem:[%s1825_s16 + $0x18] sm:$0xff]  ;;  %v359_v17 = vld [vmem:[%s1825_s16 + $0x20] sm:$0xff]  ;;  %v360_v20 = vld [vmem:[%s1825_s16 + $0x28] sm:$0xff] }
  0x1a   : > { %1462 = vmatprep.subr.mxu0 %v389_v6  ;;  %1492 = vmatprep.mubr.msk.f32.mxu1 %vm587_vm2, %v355_v8  ;;  %v379_v21 = vld [vmem:[%s1820_s28 + $0x30] sm:$0xff]  ;;  %v380_v23 = vld [vmem:[%s1820_s28 + $0x38] sm:$0xff]  ;;  %v381_v25 = vld [vmem:[%s1820_s28 + $0x40] sm:$0xff] }
  0x1b   : > { %1463 = vmatpush3.msra.mxu0 %v389_v6  ;;  %1493 = vmatmul.mubr.msk.f32.vlgmr.msra.gmra.mxu1 %vm587_vm2, %v356_v10  ;;  %v361_v22 = vld [vmem:[%s1825_s16 + $0x30] sm:$0xff]  ;;  %v362_v24 = vld [vmem:[%s1825_s16 + $0x38] sm:$0xff]  ;;  %v363_v26 = vld [vmem:[%s1825_s16 + $0x40] sm:$0xff] }
  0x1c   : > { %1465 = vmatmul.mubr.msk.f32.vlgmr.msra.gmra.mxu0 %vm393_vm1, %v374_v9  ;;  %1495 = vmatprep.mubr.msk.f32.mxu1 %vm587_vm2, %v357_v12  ;;  %v382_v27 = vld [vmem:[%s1820_s28 + $0x48] sm:$0xff]  ;;  %v383_v29 = vld [vmem:[%s1820_s28 + $0x50] sm:$0xff]  ;;  %v384_v31 = vld [vmem:[%s1820_s28 + $0x58] sm:$0xff] }
  0x1d   : > { %1467 = vmatprep.mubr.msk.f32.mxu0 %vm393_vm1, %v375_v11  ;;  %1517 = vmatpush3.msra.mxu1 %v827_v5  ;;  %v364_v28 = vld [vmem:[%s1825_s16 + $0x48] sm:$0xff]  ;;  %v365_v30 = vld [vmem:[%s1825_s16 + $0x50] sm:$0xff]  ;;  %v366_v32 = vld [vmem:[%s1825_s16 + $0x58] sm:$0xff] }
  0x1e   : > { %1518 = vmatprep.subr.mxu1 %v826_v13  ;;  %v385_v33 = vld [vmem:[%s1820_s28 + $0x60] sm:$0xff]  ;;  %v386_v35 = vld [vmem:[%s1820_s28 + $0x68] sm:$0xff]  ;;  %v387_v37 = vld [vmem:[%s1820_s28 + $0x70] sm:$0xff] }
  0x1f   : > { %1519 = vmatpush3.msra.mxu1 %v826_v13  ;;  %v367_v34 = vld [vmem:[%s1825_s16 + $0x60] sm:$0xff]  ;;  %v368_v36 = vld [vmem:[%s1825_s16 + $0x68] sm:$0xff]  ;;  %v369_v38 = vld [vmem:[%s1825_s16 + $0x70] sm:$0xff] }
  0x20   : > { %1468 = vmatmul.mubr.msk.f32.gmra.mxu0 %vm393_vm1, %v376_v14  ;;  %1496 = vmatmul.mubr.msk.f32.gmra.mxu1 %vm587_vm2, %v358_v15  ;;  %v388_v39 = vld [vmem:[%s1820_s28 + $0x78] sm:$0xff]  ;;  %v824_v41 = vld [vmem:[%s2043_s5] sm:$0xff]  ;;  %v1045_v43 = vld [vmem:[%s2045_s7 + $0x8] sm:$0xff]  ;;  %s1303_s28 = sshll.u32 %s340_s29, 2 }
  0x21   : > { %1470 = vmatprep.mubr.msk.f32.mxu0 %vm393_vm1, %v377_v16  ;;  %1498 = vmatprep.mubr.msk.f32.mxu1 %vm587_vm2, %v359_v17  ;;  %v370_v40 = vld [vmem:[%s1825_s16 + $0x78] sm:$0xff]  ;;  %v1044_v42 = vld [vmem:[%s2045_s7] sm:$0xff]  ;;  %v1046_v44 = vld [vmem:[%s2045_s7 + $0x10] sm:$0xff]  ;;  %s342_s16 = scalar_lea.vmem [#allocation2], %s1303_s28 }
  0x22   : > { %1520 = vmatprep.subr.mxu1 %v825_v18  ;;  %1054 = vxpose.xlu0.b32.start [1/4] (short) (narrow) %v1044_v42, 8  ;;  %v1047_v45 = vld [vmem:[%s2045_s7 + $0x18] sm:$0xff]  ;;  %v1915_v49 = vld [vmem:[%s2042_s4] ss:$0 sm:$0xff]  ;;  %s1228_s25 = sshll.u32 %s342_s16, 4  ;;  %s1229_s25 = int_to_ptr.vmem [resolvable:$true] %s1228_s25 }
  0x23   : > { %1521 = vmatpush3.msra.mxu1 %v825_v18  ;;  %s1631_s24 = scalar_lea.vmem %s1229_s25, 64  ;;  %p1638_p0 = scmp.lt.s32.totalorder %s1229_s25, %s1636_s27 }
  0x24   : > { %1471 = vmatmul.mubr.msk.f32.gmra.mxu0 %vm393_vm1, %v378_v19  ;;  %1499 = vmatmul.mubr.msk.f32.gmra.mxu1 %vm587_vm2, %v360_v20  ;;  %p1632_p11 = scmp.ne.s32.totalorder %s1229_s25, %s1631_s24  ;;  %p1639_p1 = scmp.lt.s32.totalorder %s1637_s13, %s1631_s24 }
  0x25   : > { %1473 = vmatprep.mubr.msk.f32.mxu0 %vm393_vm1, %v379_v21  ;;  %1501 = vmatprep.mubr.msk.f32.mxu1 %vm587_vm2, %v361_v22 }
  0x26   : > { %1522 = vmatprep.subr.mxu1 %v824_v41  ;;  %1055 = vxpose.xlu0.b32.cont [2/4] (short) (narrow) %v1045_v43, 8  ;;  %p1633_p12 = pnand %p1632_p11, %p1785_p5  ;;  %p1640_p2 = por %p1639_p1, %p1638_p0 }
  0x27   : > { %1523 = vmatpush3.msra.mxu1 %v824_v41 }
  0x28   : > { %1474 = vmatmul.mubr.msk.f32.gmra.mxu0 %vm393_vm1, %v380_v23  ;;  %1502 = vmatmul.mubr.msk.f32.gmra.mxu1 %vm587_vm2, %v362_v24  ;;  %p1634_p13 = pneg %p1633_p12 }
  0x29   : > { %1476 = vmatprep.mubr.msk.f32.mxu0 %vm393_vm1, %v381_v25  ;;  %1504 = vmatprep.mubr.msk.f32.mxu1 %vm587_vm2, %v363_v26 }
  0x2a   : > { %1056 = vxpose.xlu0.b32.cont [3/4] (short) (narrow) %v1046_v44, 8  ;;  %p1641_p3 = pnand %p1640_p2, %p1634_p13 }
  0x2c   : > { %1477 = vmatmul.mubr.msk.f32.gmra.mxu0 %vm393_vm1, %v382_v27  ;;  %1505 = vmatmul.mubr.msk.f32.gmra.mxu1 %vm587_vm2, %v364_v28 }
  0x2d   : > { %1479 = vmatprep.mubr.msk.f32.mxu0 %vm393_vm1, %v383_v29  ;;  %1507 = vmatprep.mubr.msk.f32.mxu1 %vm587_vm2, %v365_v30 }
  0x2e   : > { %1057 = vxpose.xlu0.b32.end [4/4] (short) (narrow) %v1047_v45, 8 }
  0x30   : > { %1480 = vmatmul.mubr.msk.f32.gmra.mxu0 %vm393_vm1, %v384_v31  ;;  %1508 = vmatmul.mubr.msk.f32.gmra.mxu1 %vm587_vm2, %v366_v32 }
  0x31   : > { %1482 = vmatprep.mubr.msk.f32.mxu0 %vm393_vm1, %v385_v33  ;;  %1510 = vmatprep.mubr.msk.f32.mxu1 %vm587_vm2, %v367_v34 }
  0x34   : > { %1483 = vmatmul.mubr.msk.f32.gmra.mxu0 %vm393_vm1, %v386_v35  ;;  %1511 = vmatmul.mubr.msk.f32.gmra.mxu1 %vm587_vm2, %v368_v36 }
  0x35   : > { %1485 = vmatprep.mubr.msk.f32.mxu0 %vm393_vm1, %v387_v37  ;;  %1513 = vmatprep.mubr.msk.f32.mxu1 %vm587_vm2, %v369_v38 }
  0x38   : > { %1486 = vmatmul.mubr.msk.f32.gmra.mxu0 %vm393_vm1, %v388_v39  ;;  %1514 = vmatmul.mubr.msk.f32.gmra.mxu1 %vm587_vm2, %v370_v40 }
  0xdb   : > { %v1494_v47 = vpop.f32.mrf.mxu1 }
  0xdc   : > { %v1466_v46 = vpop.f32.mrf.mxu0 }
  0xdd   : > { %v712_v48 = vadd.f32 %v1494_v47, %v1466_v46  ;;  %v706_v51 = vpop.f32.mrf.mxu1 }
  0xde   : > { %v508_v50 = vpop.f32.mrf.mxu0 }
  0xdf   : > { %v707_v52 = vadd.f32 %v706_v51, %v508_v50  ;;  %v793_v54 = vadd.f32 %v1915_v49, %v712_v48 }
  0xe0   : > { %v1469_v53 = vpop.f32.mrf.mxu0  ;;  %v1497_v55 = vpop.f32.mrf.mxu1 }
  0xe1   : > { %v792_v56 = vadd.f32 %v1915_v49, %v707_v52  ;;  %v722_v57 = vadd.f32 %v1497_v55, %v1469_v53  ;;  %v809_v63 = vmax.f32 %v793_v54, 0.0 }
  0xe2   : > { %v518_v58 = vpop.f32.mrf.mxu0  ;;  %v716_v59 = vpop.f32.mrf.mxu1 }
  0xe3   : > { %v808_v60 = vmax.f32 %v792_v56, 0.0  ;;  %v717_v61 = vadd.f32 %v716_v59, %v518_v58  ;;  %v795_v0 = vadd.f32 %v1915_v49, %v722_v57 }
  0xe4   : > { %v1472_v62 = vpop.f32.mrf.mxu0  ;;  %v1500_v1 = vpop.f32.mrf.mxu1 }
  0xe5   : > { %v794_v2 = vadd.f32 %v1915_v49, %v717_v61  ;;  %v732_v3 = vadd.f32 %v1500_v1, %v1472_v62  ;;  %1524 = vmatprep.mubr.msk.f32.mxu1 %vm393_vm1, %v808_v60  ;;  %v811_v9 = vmax.f32 %v795_v0, 0.0  ;;  %v1693_v0 = vmov 0.0  }
  0xe6   : > { %v528_v4 = vpop.f32.mrf.mxu0  ;;  %v726_v5 = vpop.f32.mrf.mxu1  ;;  %1525 = vmatmul.mubr.msk.f32.vlgmr.msra.gmra.mxu1 %vm393_vm1, %v809_v63  ;;  %1548 = vmatprep.subr.mxu0 %v1693_v0  ;;  %v1695_v1 = vmov 0  }
  0xe7   : > { %v810_v6 = vmax.f32 %v794_v2, 0.0  ;;  %v727_v7 = vadd.f32 %v726_v5, %v528_v4  ;;  %v797_v10 = vadd.f32 %v1915_v49, %v732_v3  ;;  %1580 = vmatprep.mubr.msk.f32.mxu0 %vm1694_vm3, %v1693_v0  ;;  %1625 = vset.pattern.permute.xlu1 %v1695_v1 }
  0xe8   : > { %v1475_v8 = vpop.f32.mrf.mxu0  ;;  %v1503_v11 = vpop.f32.mrf.mxu1  ;;  %1626 = vset.pattern.permute.xlu0 %v1695_v1 }
  0xe9   : > { %v796_v12 = vadd.f32 %v1915_v49, %v727_v7  ;;  %v742_v13 = vadd.f32 %v1503_v11, %v1475_v8  ;;  %1527 = vmatprep.mubr.msk.f32.mxu1 %vm393_vm1, %v810_v6  ;;  %v813_v19 = vmax.f32 %v797_v10, 0.0 }
  0xea   : > { %v538_v14 = vpop.f32.mrf.mxu0  ;;  %v736_v15 = vpop.f32.mrf.mxu1  ;;  %1528 = vmatmul.mubr.msk.f32.gmra.mxu1 %vm393_vm1, %v811_v9 }
  0xeb   : > { %v812_v16 = vmax.f32 %v796_v12, 0.0  ;;  %v737_v17 = vadd.f32 %v736_v15, %v538_v14  ;;  %v799_v20 = vadd.f32 %v1915_v49, %v742_v13 }
  0xec   : > { %v1478_v18 = vpop.f32.mrf.mxu0  ;;  %v1506_v21 = vpop.f32.mrf.mxu1 }
  0xed   : > { %v798_v22 = vadd.f32 %v1915_v49, %v737_v17  ;;  %v752_v23 = vadd.f32 %v1506_v21, %v1478_v18  ;;  %1530 = vmatprep.mubr.msk.f32.mxu1 %vm393_vm1, %v812_v16  ;;  %v815_v29 = vmax.f32 %v799_v20, 0.0  ;;  %v1342_v16 = vld [vmem:[%s2044_s6] ss:$0 sm:$0xff] }
  0xee   : > { %v548_v24 = vpop.f32.mrf.mxu0  ;;  %v746_v25 = vpop.f32.mrf.mxu1  ;;  %1531 = vmatmul.mubr.msk.f32.gmra.mxu1 %vm393_vm1, %v813_v19 }
  0xef   : > { %v814_v26 = vmax.f32 %v798_v22, 0.0  ;;  %v747_v27 = vadd.f32 %v746_v25, %v548_v24  ;;  %v801_v30 = vadd.f32 %v1915_v49, %v752_v23 }
  0xf0   : > { %v1481_v28 = vpop.f32.mrf.mxu0  ;;  %v1509_v31 = vpop.f32.mrf.mxu1 }
  0xf1   : > { %v800_v32 = vadd.f32 %v1915_v49, %v747_v27  ;;  %v762_v33 = vadd.f32 %v1509_v31, %v1481_v28  ;;  %1533 = vmatprep.mubr.msk.f32.mxu1 %vm393_vm1, %v814_v26  ;;  %v817_v39 = vmax.f32 %v801_v30, 0.0 }
  0xf2   : > { %v558_v34 = vpop.f32.mrf.mxu0  ;;  %v756_v35 = vpop.f32.mrf.mxu1  ;;  %1534 = vmatmul.mubr.msk.f32.gmra.mxu1 %vm393_vm1, %v815_v29 }
  0xf3   : > { %v816_v36 = vmax.f32 %v800_v32, 0.0  ;;  %v757_v37 = vadd.f32 %v756_v35, %v558_v34  ;;  %v803_v40 = vadd.f32 %v1915_v49, %v762_v33 }
  0xf4   : > { %v1484_v38 = vpop.f32.mrf.mxu0  ;;  %v1512_v41 = vpop.f32.mrf.mxu1 }
  0xf5   : > { %v802_v42 = vadd.f32 %v1915_v49, %v757_v37  ;;  %v772_v43 = vadd.f32 %v1512_v41, %v1484_v38  ;;  %1536 = vmatprep.mubr.msk.f32.mxu1 %vm393_vm1, %v816_v36  ;;  %v819_v50 = vmax.f32 %v803_v40, 0.0 }
  0xf6   : > { %v568_v44 = vpop.f32.mrf.mxu0  ;;  %v766_v45 = vpop.f32.mrf.mxu1  ;;  %1537 = vmatmul.mubr.msk.f32.gmra.mxu1 %vm393_vm1, %v817_v39 }
  0xf7   : > { %v818_v46 = vmax.f32 %v802_v42, 0.0  ;;  %v767_v47 = vadd.f32 %v766_v45, %v568_v44  ;;  %v805_v51 = vadd.f32 %v1915_v49, %v772_v43 }
  0xf8   : > { %v1487_v48 = vpop.f32.mrf.mxu0  ;;  %v1515_v52 = vpop.f32.mrf.mxu1 }
  0xf9   : > { %v804_v53 = vadd.f32 %v1915_v49, %v767_v47  ;;  %v782_v54 = vadd.f32 %v1515_v52, %v1487_v48  ;;  %1539 = vmatprep.mubr.msk.f32.mxu1 %vm393_vm1, %v818_v46  ;;  %v821_v59 = vmax.f32 %v805_v51, 0.0  ;;  %v1070_v52 = vpop.trf.xlu0 }
  0xfa   : > { %v578_v55 = vpop.f32.mrf.mxu0  ;;  %v776_v56 = vpop.f32.mrf.mxu1  ;;  %1540 = vmatmul.mubr.msk.f32.gmra.mxu1 %vm393_vm1, %v819_v50 }
  0xfb   : > { %v820_v57 = vmax.f32 %v804_v53, 0.0  ;;  %v777_v58 = vadd.f32 %v776_v56, %v578_v55  ;;  %v807_v60 = vadd.f32 %v1915_v49, %v782_v54 }
  0xfd   : > { %v806_v61 = vadd.f32 %v1915_v49, %v777_v58  ;;  %1542 = vmatprep.mubr.msk.f32.mxu1 %vm393_vm1, %v820_v57  ;;  %v823_v63 = vmax.f32 %v807_v60, 0.0  ;;  %v1048_v49 = vld [vmem:[%s2046_s8] sm:$0x7] }
  0xfe   : > { %1543 = vmatmul.mubr.msk.f32.gmra.mxu1 %vm393_vm1, %v821_v59  ;;  %1051 = vperm.xlu1 %1625, %v1048_v49  }
  0xff   : > { %v822_v62 = vmax.f32 %v806_v61, 0.0 }
 0x101   : > { %1545 = vmatprep.mubr.msk.f32.mxu1 %vm393_vm1, %v822_v62 }
 0x102   : > { %1546 = vmatmul.mubr.msk.f32.gmra.mxu1 %vm393_vm1, %v823_v63 }
 0x179   : > { %v1052_v53 = vpop.permute.xlu1 %1051 }
 0x1a6   : > { %v1954_v2 = vpop.f32.mrf.mxu1 }
 0x1a7   : > { %v955_v46 = vadd.f32 %v1954_v2, %v1342_v16 }
 0x1a8   : > { %v1956_v3 = vpop.f32.mrf.mxu1 }
 0x1a9   : > { %v1029_v48 = vmax.f32 %v955_v46, 0.0  ;;  %v950_v50 = vadd.f32 %v1342_v16, %v1956_v3 }
 0x1aa   : > { %v1529_v4 = vpop.f32.mrf.mxu1 }
 0x1ab   : > { %v965_v42 = vadd.f32 %v1529_v4, %v1342_v16  ;;  %v1028_v51 = vmax.f32 %v950_v50, 0.0 }
 0x1ac   : > { %v1958_v5 = vpop.f32.mrf.mxu1 }
 0x1ad   : > { %v1031_v44 = vmax.f32 %v965_v42, 0.0  ;;  %v960_v45 = vadd.f32 %v1342_v16, %v1958_v5 }
 0x1ae   : > { %v1532_v6 = vpop.f32.mrf.mxu1 }
 0x1af   : > { %v975_v38 = vadd.f32 %v1532_v6, %v1342_v16  ;;  %v1030_v47 = vmax.f32 %v960_v45, 0.0 }
 0x1b0   : > { %v969_v7 = vpop.f32.mrf.mxu1 }
 0x1b1   : > { %v1033_v40 = vmax.f32 %v975_v38, 0.0  ;;  %v970_v41 = vadd.f32 %v1342_v16, %v969_v7 }
 0x1b2   : > { %v1535_v8 = vpop.f32.mrf.mxu1 }
 0x1b3   : > { %v985_v34 = vadd.f32 %v1535_v8, %v1342_v16  ;;  %v1032_v43 = vmax.f32 %v970_v41, 0.0 }
 0x1b4   : > { %v979_v9 = vpop.f32.mrf.mxu1 }
 0x1b5   : > { %v1035_v36 = vmax.f32 %v985_v34, 0.0  ;;  %v980_v37 = vadd.f32 %v1342_v16, %v979_v9 }
 0x1b6   : > { %v1538_v10 = vpop.f32.mrf.mxu1 }
 0x1b7   : > { %v995_v30 = vadd.f32 %v1538_v10, %v1342_v16  ;;  %v1034_v39 = vmax.f32 %v980_v37, 0.0 }
 0x1b8   : > { %v989_v11 = vpop.f32.mrf.mxu1 }
 0x1b9   : > { %v1037_v32 = vmax.f32 %v995_v30, 0.0  ;;  %v990_v33 = vadd.f32 %v1342_v16, %v989_v11 }
 0x1ba   : > { %v1541_v12 = vpop.f32.mrf.mxu1 }
 0x1bb   : > { %v1005_v26 = vadd.f32 %v1541_v12, %v1342_v16  ;;  %v1036_v35 = vmax.f32 %v990_v33, 0.0 }
 0x1bc   : > { %v999_v13 = vpop.f32.mrf.mxu1 }
 0x1bd   : > { %v1039_v28 = vmax.f32 %v1005_v26, 0.0  ;;  %v1000_v29 = vadd.f32 %v1342_v16, %v999_v13 }
 0x1be   : > { %v1544_v14 = vpop.f32.mrf.mxu1 }
 0x1bf   : > { %v1015_v22 = vadd.f32 %v1544_v14, %v1342_v16  ;;  %v1038_v31 = vmax.f32 %v1000_v29, 0.0 }
 0x1c0   : > { %v1009_v15 = vpop.f32.mrf.mxu1 }
 0x1c1   : > { %v1041_v24 = vmax.f32 %v1015_v22, 0.0  ;;  %v1010_v25 = vadd.f32 %v1342_v16, %v1009_v15 }
 0x1c2   : > { %v1547_v17 = vpop.f32.mrf.mxu1 }
 0x1c3   : > { %v1025_v18 = vadd.f32 %v1547_v17, %v1342_v16  ;;  %v1040_v27 = vmax.f32 %v1010_v25, 0.0 }
 0x1c4   : > { %v1019_v19 = vpop.f32.mrf.mxu1 }
 0x1c5   : > { %v1043_v20 = vmax.f32 %v1025_v18, 0.0  ;;  %v1020_v21 = vadd.f32 %v1342_v16, %v1019_v19 }
 0x1c7   : > { %1549 = vmatpush3.xpose.msk.msra.mxu0 %vm393_vm1, %v1043_v20  ;;  %v1042_v23 = vmax.f32 %v1020_v21, 0.0 }
 0x1c8   : > { %1550 = vmatprep.subr.mxu0 %v1693_v0 }
 0x1cb   : > { %1551 = vmatpush3.xpose.msk.msra.mxu0 %vm393_vm1, %v1042_v23 }
 0x1cc   : > { %1552 = vmatprep.subr.mxu0 %v1693_v0 }
 0x1cf   : > { %1553 = vmatpush3.xpose.msk.msra.mxu0 %vm393_vm1, %v1041_v24 }
 0x1d0   : > { %1554 = vmatprep.subr.mxu0 %v1693_v0 }
 0x1d3   : > { %1555 = vmatpush3.xpose.msk.msra.mxu0 %vm393_vm1, %v1040_v27 }
 0x1d4   : > { %1556 = vmatprep.subr.mxu0 %v1693_v0 }
 0x1d7   : > { %1557 = vmatpush3.xpose.msk.msra.mxu0 %vm393_vm1, %v1039_v28 }
 0x1d8   : > { %1558 = vmatprep.subr.mxu0 %v1693_v0 }
 0x1db   : > { %1559 = vmatpush3.xpose.msk.msra.mxu0 %vm393_vm1, %v1038_v31 }
 0x1dc   : > { %1560 = vmatprep.subr.mxu0 %v1693_v0 }
 0x1df   : > { %1561 = vmatpush3.xpose.msk.msra.mxu0 %vm393_vm1, %v1037_v32 }
 0x1e0   : > { %1562 = vmatprep.subr.mxu0 %v1693_v0 }
 0x1e3   : > { %1563 = vmatpush3.xpose.msk.msra.mxu0 %vm393_vm1, %v1036_v35 }
 0x1e4   : > { %1564 = vmatprep.subr.mxu0 %v1693_v0 }
 0x1e7   : > { %1565 = vmatpush3.xpose.msk.msra.mxu0 %vm393_vm1, %v1035_v36 }
 0x1e8   : > { %1566 = vmatprep.subr.mxu0 %v1693_v0 }
 0x1eb   : > { %1567 = vmatpush3.xpose.msk.msra.mxu0 %vm393_vm1, %v1034_v39 }
 0x1ec   : > { %1568 = vmatprep.subr.mxu0 %v1693_v0 }
 0x1ef   : > { %1569 = vmatpush3.xpose.msk.msra.mxu0 %vm393_vm1, %v1033_v40 }
 0x1f0   : > { %1570 = vmatprep.subr.mxu0 %v1693_v0 }
 0x1f3   : > { %1571 = vmatpush3.xpose.msk.msra.mxu0 %vm393_vm1, %v1032_v43 }
 0x1f4   : > { %1572 = vmatprep.subr.mxu0 %v1693_v0 }
 0x1f7   : > { %1573 = vmatpush3.xpose.msk.msra.mxu0 %vm393_vm1, %v1031_v44 }
 0x1f8   : > { %1574 = vmatprep.subr.mxu0 %v1693_v0 }
 0x1fb   : > { %1575 = vmatpush3.xpose.msk.msra.mxu0 %vm393_vm1, %v1030_v47 }
 0x1fc   : > { %1576 = vmatprep.subr.mxu0 %v1693_v0 }
 0x1ff   : > { %1577 = vmatpush3.xpose.msk.msra.mxu0 %vm393_vm1, %v1029_v48 }
 0x200   : > { %1578 = vmatprep.subr.mxu0 %v1693_v0 }
 0x203   : > { %1579 = vmatpush3.xpose.msk.msra.mxu0 %vm393_vm1, %v1028_v51 }
 0x206   : > { %1581 = vmatmul.mubr.msk.f32.vlgmr.msra.gmra.mxu0 %vm393_vm1, %v1070_v52 }
 0x2c6   : > { %v1203_v54 = vpop.f32.mrf.mxu0 }
 0x2c7   : > { %v1204_v55 = vadd.f32 %v1203_v54, %v1052_v53 }
 0x2c8   : > { %v1582_v56 = vpop.f32.mrf.mxu0 }
 0x2c9   : > { %v1376_v57 = vmul.f32 -1.442695, %v1204_v55 }
 0x2cb   : > { %1627 = vpow2.f32 %v1376_v57 }
 0x2d8   : > { %v1628_v58 = vpop.eup %1627 }
 0x2d9   : > { %v1210_v59 = vadd.f32 1.0, %v1628_v58 }
 0x2db   : > { %1629 = vrcp.f32 %v1210_v59 }
 0x2e8   : > { %v1630_v60 = vpop.eup %1629 }
 0x2e9   : > { %1213 = vst [vmem:[%s342_s16] sm:$0x7] %v1630_v60 }
 0x2ea   : > { %1644 = shalt.err (!%p1641_p3)
}
 0x2eb   : > { %s1645_s28 = scalar_lea.hbm %s2003_s22, 64  ;;  %s1649_s16 = scalar_lea.hbm %s2047_s9, 128 }
 0x2ec   : > { %p1646_p4 = scmp.ne.s32.totalorder %s2003_s22, %s1645_s28  ;;  %p1650_p9 = scmp.lt.s32.totalorder %s2003_s22, %s2047_s9 }
 0x2ed   : > { %p1651_p10 = scmp.lt.s32.totalorder %s1649_s16, %s1645_s28 }
 0x2ee   : > { %p1647_p7 = pnand %p1646_p4, %p1785_p5 }
 0x2ef   : > { %p1652_p11 = por %p1651_p10, %p1650_p9 }
 0x2f0   : > { %p1648_p8 = pneg %p1647_p7 }
 0x2f2   : > { %p1653_p12 = pnand %p1652_p11, %p1648_p8 }
 0x2f4   : > { %1656 = shalt.err (!%p1653_p12)
}
 0x2f5   : > { %1583 = dma.vmem_to_hbm [thread:$0]  (%p1785_p5), %s1229_s25, 64, %s2003_s22, %s1215_s23  }
 0x2f6 PF: > { %p1589_p13 = scmp.ge.s32.totalorder %s1691_s12, 2  ;;  %s1240_s24 = sand.u32 1, %s1679_s30  }
 0x2f7   : > { %s1241_s26 = scalar_lea.sflag [#allocation3], %s1240_s24 }
 0x2f8   : > { %p1586_p0 = pnand %p1589_p13, %p1789_p6 }
 0x2fa   : > { %p1587_p1 = pneg %p1586_p0 }
 0x2fc   : > { %1674 = dma.done.wait (%p1587_p1), %s1241_s26, 64  }
 0x2fd   : > { %1676 = vsyncadd (%p1587_p1), %s1241_s26, 4294967232  ;;  %p19_p2 = scmp.ge.s32.totalorder %s1772_s15, 4   ;;  %s2050_s30 = smov %s1683_s10 }
 0x2fe   : > { %s2051_s10 = smov %s1687_s11  ;;  %s2052_s11 = smov %s1783_s18 }
 0x2ff   : > { %s2053_s12 = smov %s1772_s15  ;;  %21 = sbr.rel (!%p19_p2) target bundleno = 3 (0x3), region = 94 }
 0x304   :  { %1246 = vsyncpa [#allocation3], 1 }
 0x305   :  { %1248 = vsyncpa [#allocation3 + $0x1], 1 }

</bundles_post_ra>
